<compile_context>
chip_gen: v7x
topology: tpu7x:2x2x1
jax: 0.10.0
libtpu: 0.0.40
codegen_flags: <defaults>
</compile_context>

<pallas_src>
import functools

import jax
import jax.numpy as jnp
from jax.experimental import pallas as pl
from jax.experimental.pallas import tpu as pltpu

_LANE = 128
_LN2 = 0.6931471805599453


def _round_up(x, m):
    return ((x + m - 1) // m) * m


def _tpu_generation():
    """Best-effort TPU generation from device_kind; 0 if unknown."""
    try:
        kind = jax.devices()[0].device_kind.lower()
    except Exception:
        return 0
    for g in (7, 6, 5, 4, 3, 2):
        if (f"v{g}" in kind) or (f"tpu{g}" in kind):
            return g
    return 0


def _logcosh_sum_kernel(y_ref, yp_ref, acc_ref, *, tile, n_tiles, rem_last,
                        has_dup, bf16_transcendentals):
    # acc_ref: (8, 128) f32 accumulator block, resident across the inner
    # ("arbitrary") grid axis; one distinct block per entry of the core axis.
    @pl.when(pl.program_id(1) == 0)
    def _init():
        acc_ref[...] = jnp.zeros_like(acc_ref)

    x = (y_ref[...].astype(jnp.float32)
         - yp_ref[...].astype(jnp.float32)
         + jnp.float32(1e-12))
    ax = jnp.abs(x)
    # Numerically stable: log(cosh(x)) = |x| + log(1 + exp(-2|x|)) - log(2)
    # (2 transcendentals, no f32 overflow).
    m2ax = jnp.float32(-2.0) * ax
    if bf16_transcendentals:
        # bf16 EUP on v6e/v7x: ~2x transcendental throughput; |x| and the
        # accumulation stay in f32.  (log1p avoided: not all Mosaic versions
        # lower it; the extra VPU add is free here.)
        t = jnp.log(1.0 + jnp.exp(m2ax.astype(jnp.bfloat16))).astype(jnp.float32)
    else:
        t = jnp.log(1.0 + jnp.exp(m2ax))
    val = ax + t - jnp.float32(_LN2)

    t8 = tile // 8

    def _accum(v):
        v3 = v.reshape(t8, 8, _LANE)
        if t8 % 4 == 0 and t8 >= 8:
            # 4 independent partial sums -> ILP on the VPU instead of one
            # long serial add chain into the same vreg group.
            q = t8 // 4
            p0 = jnp.sum(v3[0 * q:1 * q], axis=0)
            p1 = jnp.sum(v3[1 * q:2 * q], axis=0)
            p2 = jnp.sum(v3[2 * q:3 * q], axis=0)
            p3 = jnp.sum(v3[3 * q:4 * q], axis=0)
            acc_ref[...] += (p0 + p1) + (p2 + p3)
        else:
            acc_ref[...] += jnp.sum(v3, axis=0)

    ragged_tail = rem_last != tile * _LANE

    if not ragged_tail and not has_dup:
        # Every block is full and valid: no masking anywhere.
        _accum(val)
    else:
        blk = pl.program_id(0) * pl.num_programs(1) + pl.program_id(1)

        @pl.when(blk < n_tiles - 1)
        def _interior():
            _accum(val)                 # unmasked fast path for interior blocks

        @pl.when(blk == n_tiles - 1)
        def _tail():
            if ragged_tail:
                # Block-local index vs remaining valid elements in this block:
                # no global flat index -> no int32 overflow for huge inputs.
                row = jax.lax.broadcasted_iota(jnp.int32, (tile, _LANE), 0)
                lane = jax.lax.broadcasted_iota(jnp.int32, (tile, _LANE), 1)
                _accum(jnp.where(row * _LANE + lane < rem_last, val,
                                 jnp.float32(0.0)))
            else:
                _accum(val)
        # Blocks with blk > n_tiles-1 (clamped duplicates from the core split)
        # fall through without accumulating.


def log_cosh_loss(y_t, y_prime_t, *, min_pallas_elems=65536,
                  allow_bf16_transcendentals=None):
    """Pallas TPU implementation of mean(log(cosh(y_t - y_prime_t + 1e-12)))."""
    assert y_t.shape == y_prime_t.shape
    n_elems = int(y_t.size)

    gen = _tpu_generation()
    if allow_bf16_transcendentals is None:
        bf16_eup = gen >= 6          # v6e/v7x have bf16 EUP; keep f32 on v5e
    else:
        bf16_eup = bool(allow_bf16_transcendentals)

    # Small-input fast path: XLA's fused elementwise+reduce beats the fixed
    # pallas_call / grid / DMA setup cost for tiny tensors.
    if n_elems < max(int(min_pallas_elems), 8 * _LANE):
        x = (y_t.astype(jnp.float32) - y_prime_t.astype(jnp.float32)
             + jnp.float32(1e-12))
        ax = jnp.abs(x)
        return (jnp.mean(ax + jnp.log1p(jnp.exp(-2.0 * ax)))
                - jnp.float32(_LN2)).astype(jnp.float32)

    num_cores = 2 if gen >= 7 else 1          # v7x: shard leading axis over 2 TCs
    max_tile = 8192 if gen >= 6 else 4096     # v5e: smaller scoped-VMEM budget

    y_flat = jnp.ravel(y_t)
    yp_flat = jnp.ravel(y_prime_t)
    rows = pl.cdiv(n_elems, _LANE)
    pad = rows * _LANE - n_elems
    if pad:
        # Only when n is not lane-aligned (<=127 pad elems).  128-aligned
        # inputs reshape for free -> no extra HBM copy.
        y_flat = jnp.pad(y_flat, (0, pad))
        yp_flat = jnp.pad(yp_flat, (0, pad))
    y2d = y_flat.reshape(rows, _LANE)
    yp2d = yp_flat.reshape(rows, _LANE)

    tile = min(max_tile, _round_up(rows, 8))  # multiple of 8; may overhang rows
    n_tiles = pl.cdiv(rows, tile)
    tiles_per_core = pl.cdiv(n_tiles, num_cores)
    has_dup = num_cores * tiles_per_core > n_tiles
    rem_last = n_elems - (n_tiles - 1) * tile * _LANE  # valid elems in last block

    def in_map(c, i):
        # Clamp overhang blocks of the core split to a valid block; their
        # (duplicated) contribution is skipped inside the kernel.
        return (jnp.minimum(c * tiles_per_core + i, n_tiles - 1), 0)

    kernel = functools.partial(
        _logcosh_sum_kernel, tile=tile, n_tiles=n_tiles, rem_last=rem_last,
        has_dup=has_dup, bf16_transcendentals=bf16_eup)

    in_block_bytes = 2 * tile * _LANE * (y2d.dtype.itemsize
                                         + yp2d.dtype.itemsize)
    vmem_limit = int(max(32 << 20, in_block_bytes + (16 << 20)))

    cost = pl.CostEstimate(
        flops=8 * n_elems,
        transcendentals=2 * n_elems,
        bytes_accessed=n_elems * (y2d.dtype.itemsize + yp2d.dtype.itemsize)
        + num_cores * 8 * _LANE * 4)

    partial_sums = pl.pallas_call(
        kernel,
        out_shape=jax.ShapeDtypeStruct((num_cores * 8, _LANE), jnp.float32),
        grid_spec=pltpu.PrefetchScalarGridSpec(
            num_scalar_prefetch=0,
            grid=(num_cores, tiles_per_core),
            in_specs=[
                pl.BlockSpec((tile, _LANE), in_map),
                pl.BlockSpec((tile, _LANE), in_map),
            ],
            out_specs=pl.BlockSpec((8, _LANE), lambda c, i: (c, 0)),
        ),
        compiler_params=pltpu.CompilerParams(
            dimension_semantics=("parallel", "arbitrary"),
            vmem_limit_bytes=vmem_limit),
        cost_estimate=cost,
    )(y2d, yp2d)

    total = jnp.sum(partial_sums, dtype=jnp.float32)
    return (total / jnp.float32(n_elems)).astype(jnp.float32)


if __name__ == "__main__":
    key = jax.random.PRNGKey(0)
    k1, k2, k3, k4 = jax.random.split(key, 4)

    def ref_loss(a, b):
        return jnp.mean(jnp.log(jnp.cosh(a - b + 1e-12)))

    # 1) Small NCHW demo shape; force the Pallas path with exact f32
    #    transcendentals -> tight check.
    y_t = jax.random.normal(k1, (2, 4, 16, 16), dtype=jnp.float32)
    y_prime_t = jax.random.normal(k2, (2, 4, 16, 16), dtype=jnp.float32)
    loss = log_cosh_loss(y_t, y_prime_t, min_pallas_elems=0,
                         allow_bf16_transcendentals=False)
    jax.block_until_ready(loss)
    ref = ref_loss(y_t, y_prime_t)
    assert jnp.allclose(loss, ref, atol=1e-5, rtol=1e-5), (loss, ref)

    # 2) Same inputs through the default per-generation path (bf16 exp/log on
    #    v6e/v7x) -> modestly wider tolerance.
    loss_fast = log_cosh_loss(y_t, y_prime_t, min_pallas_elems=0)
    jax.block_until_ready(loss_fast)
    assert jnp.allclose(loss_fast, ref, atol=5e-3, rtol=2e-2), (loss_fast, ref)

    # 3) Larger lane-aligned input: multi-block grid, ragged-tail mask, core
    #    split; exact transcendentals for a tight check.
    y_big = jax.random.normal(k3, (2, 4, 384, 500), dtype=jnp.float32)
    yp_big = jax.random.normal(k4, (2, 4, 384, 500), dtype=jnp.float32)
    loss_big = log_cosh_loss(y_big, yp_big, allow_bf16_transcendentals=False)
    jax.block_until_ready(loss_big)
    ref_big = ref_loss(y_big, yp_big)
    assert jnp.allclose(loss_big, ref_big, atol=1e-4, rtol=1e-4), (loss_big, ref_big)

    # 4) Non-128-aligned odd shape: pad path + tail mask + duplicate-block skip.
    y_odd = jax.random.normal(k1, (3, 5, 17, 23), dtype=jnp.float32)
    yp_odd = jax.random.normal(k2, (3, 5, 17, 23), dtype=jnp.float32)
    loss_odd = log_cosh_loss(y_odd, yp_odd, min_pallas_elems=0,
                             allow_bf16_transcendentals=False)
    jax.block_until_ready(loss_odd)
    ref_odd = ref_loss(y_odd, yp_odd)
    assert jnp.allclose(loss_odd, ref_odd, atol=1e-5, rtol=1e-5), (loss_odd, ref_odd)

    print("KERNEL_OK")
</pallas_src>

<mosaic_0001>
module attributes {stable_mosaic.version = 11 : i64} {
  func.func @_logcosh_sum_kernel(%arg0: i32, %arg1: i32, %arg2: memref<16x128xf32, #tpu.memory_space<vmem>>, %arg3: memref<16x128xf32, #tpu.memory_space<vmem>>, %arg4: memref<8x128xf32, #tpu.memory_space<vmem>>) attributes {dimension_semantics = [#tpu.dimension_semantics<parallel>, #tpu.dimension_semantics<arbitrary>], iteration_bounds = array<i64: 1, 1>, scalar_prefetch = 0 : i64, scratch_operands = 0 : i64, tpu.core_type = #tpu.core_type<tc>, window_params = [{transform_indices = @transform_0, window_bounds = array<i64: 16, 128>}, {transform_indices = @transform_1, window_bounds = array<i64: 16, 128>}, {transform_indices = @transform_2, window_bounds = array<i64: 8, 128>}]} {
    %c0_i32 = arith.constant 0 : i32
    %0 = arith.cmpi eq, %arg1, %c0_i32 : i32
    %1 = arith.extui %0 : i1 to i32
    %c0_i32_0 = arith.constant 0 : i32
    %2 = arith.cmpi ne, %1, %c0_i32_0 : i32
    scf.if %2 {
      %cst_12 = arith.constant 0.000000e+00 : f32
      %23 = vector.broadcast %cst_12 : f32 to vector<8x128xf32>
      %c0_13 = arith.constant 0 : index
      %c0_14 = arith.constant 0 : index
      %24 = vector.load %arg4[%c0_13, %c0_14] : memref<8x128xf32, #tpu.memory_space<vmem>>, vector<8x128xf32>
      tpu.vector_store %arg4[%c0_13, %c0_14], %23 {strides = array<i32>} : memref<8x128xf32, #tpu.memory_space<vmem>>, vector<8x128xf32>,
    } else {
    }
    %c0 = arith.constant 0 : index
    %c0_1 = arith.constant 0 : index
    %3 = vector.load %arg2[%c0, %c0_1] : memref<16x128xf32, #tpu.memory_space<vmem>>, vector<16x128xf32>
    %c0_2 = arith.constant 0 : index
    %c0_3 = arith.constant 0 : index
    %4 = vector.load %arg3[%c0_2, %c0_3] : memref<16x128xf32, #tpu.memory_space<vmem>>, vector<16x128xf32>
    %5 = arith.subf %3, %4 : vector<16x128xf32>
    %cst = arith.constant 9.99999996E-13 : f32
    %6 = vector.broadcast %cst : f32 to vector<16x128xf32>
    %7 = arith.addf %5, %6 : vector<16x128xf32>
    %8 = math.absf %7 : vector<16x128xf32>
    %cst_4 = arith.constant -2.000000e+00 : f32
    %9 = vector.broadcast %cst_4 : f32 to vector<16x128xf32>
    %10 = arith.mulf %9, %8 : vector<16x128xf32>
    %11 = math.exp %10 : vector<16x128xf32>
    %cst_5 = arith.constant 1.000000e+00 : f32
    %12 = vector.broadcast %cst_5 : f32 to vector<16x128xf32>
    %13 = arith.addf %12, %11 : vector<16x128xf32>
    %14 = math.log %13 : vector<16x128xf32>
    %15 = arith.addf %8, %14 : vector<16x128xf32>
    %cst_6 = arith.constant 0.693147182 : f32
    %16 = vector.broadcast %cst_6 : f32 to vector<16x128xf32>
    %17 = arith.subf %15, %16 : vector<16x128xf32>
    %18 = vector.shape_cast %17 : vector<16x128xf32> to vector<2x8x128xf32>
    %c0_7 = arith.constant 0 : index
    %c0_8 = arith.constant 0 : index
    %19 = vector.load %arg4[%c0_7, %c0_8] : memref<8x128xf32, #tpu.memory_space<vmem>>, vector<8x128xf32>
    %cst_9 = arith.constant dense<0.000000e+00> : vector<8x128xf32>
    %20 = vector.multi_reduction <add>, %18, %cst_9 [0] : vector<2x8x128xf32> to vector<8x128xf32>
    %21 = arith.addf %19, %20 : vector<8x128xf32>
    %c0_10 = arith.constant 0 : index
    %c0_11 = arith.constant 0 : index
    %22 = vector.load %arg4[%c0_10, %c0_11] : memref<8x128xf32, #tpu.memory_space<vmem>>, vector<8x128xf32>
    tpu.vector_store %arg4[%c0_10, %c0_11], %21 {strides = array<i32>} : memref<8x128xf32, #tpu.memory_space<vmem>>, vector<8x128xf32>,
    return
  }
  func.func @transform_0(%arg0: i32, %arg1: i32) -> (i32, i32) {
    %c1_i32 = arith.constant 1 : i32
    %0 = arith.muli %arg0, %c1_i32 : i32
    %1 = arith.addi %0, %arg1 : i32
    %c0_i32 = arith.constant 0 : i32
    %2 = arith.minsi %1, %c0_i32 : i32
    %c0_i32_0 = arith.constant 0 : i32
    %c0_i32_1 = arith.constant 0 : i32
    return %2, %c0_i32_0 : i32, i32
  }
  func.func @transform_1(%arg0: i32, %arg1: i32) -> (i32, i32) {
    %c1_i32 = arith.constant 1 : i32
    %0 = arith.muli %arg0, %c1_i32 : i32
    %1 = arith.addi %0, %arg1 : i32
    %c0_i32 = arith.constant 0 : i32
    %2 = arith.minsi %1, %c0_i32 : i32
    %c0_i32_0 = arith.constant 0 : i32
    %c0_i32_1 = arith.constant 0 : i32
    return %2, %c0_i32_0 : i32, i32
  }
  func.func @transform_2(%arg0: i32, %arg1: i32) -> (i32, i32) {
    %c0_i32 = arith.constant 0 : i32
    %c0_i32_0 = arith.constant 0 : i32
    return %arg0, %c0_i32 : i32, i32
  }
}

</mosaic_0001>

<bundles_post_ra>
// kernel: tpu_custom_call.1
= control target key start
LH: loop header
LB: loop body
LE: loop exit
PB: predicated region body
PF: predicated region fallthrough
CT: control target
= control target key end

     0   :  { %7 = vsyncpa [#allocation3], 0  ;;  %s259_s0 = inlined_call_operand.hbm [shape: f32[16,128], index: 0, kind: input, shape index: {}]   ;;  %s260_s1 = inlined_call_operand.hbm [shape: f32[16,128], index: 1, kind: input, shape index: {}]   ;;  %s261_s2 = inlined_call_operand.hbm [shape: f32[8,128], index: 2, kind: output, shape index: {}]  }
   0x1   :  { %8 = vsyncpa [#allocation6], 0 }
   0x2   :  { %9 = vsyncpa [#allocation4], 0  ;;  %s203_s9 = smov [#allocation2]   ;;  %s131_s13 = scalar_lea.hbm %s259_s0, 256 }
   0x3   :  { %s21_s10 = sshll.u32 %s203_s9, 4  ;;  %p132_p0 = scmp.ne.s32.totalorder %s259_s0, %s131_s13  ;;  %s22_s10 = int_to_ptr.vmem [resolvable:$true] %s21_s10 }
   0x4   :  { %p135_p1 = scmp.lt.u32.totalorder %s131_s13, %s259_s0 }
   0x6   :  { %p137_p2 = pnand %p135_p1, %p132_p0 }
   0x8   :  { %140 = shalt.err (!%p137_p2)
}
   0x9   :  { %s141_s18 = scalar_lea.vmem %s22_s10, 256  ;;  %p146_p4 = scmp.lt.s32.totalorder %s22_s10, %s22_s10 }
   0xa   :  { %p142_p3 = scmp.ne.s32.totalorder %s22_s10, %s141_s18  ;;  %p147_p5 = scmp.lt.s32.totalorder %s141_s18, %s141_s18 }
   0xc   :  { %p148_p6 = por %p147_p5, %p146_p4 }
   0xe   :  { %p149_p7 = pnand %p148_p6, %p142_p3 }
  0x10   :  { %152 = shalt.err (!%p149_p7)
}
  0x11   :  { %s204_s19 = smov 128   ;;  %s205_s20 = smov 8  }
  0x12   :  { %27 = dma.hbm_to_vmem [thread:$0]  %s259_s0, 256, %s22_s10, [#allocation3], %s204_s19, %s204_s19, %s205_s20  }
  0x13   :  { %s206_s23 = smov [#allocation5]   ;;  %s153_s27 = scalar_lea.hbm %s260_s1, 256 }
  0x14   :  { %s39_s24 = sshll.u32 %s206_s23, 4  ;;  %p154_p8 = scmp.ne.s32.totalorder %s260_s1, %s153_s27  ;;  %s40_s24 = int_to_ptr.vmem [resolvable:$true] %s39_s24 }
  0x15   :  { %p157_p9 = scmp.lt.u32.totalorder %s153_s27, %s260_s1 }
  0x17   :  { %p159_p10 = pnand %p157_p9, %p154_p8 }
  0x19   :  { %162 = shalt.err (!%p159_p10)
}
  0x1a   :  { %s163_s4 = scalar_lea.vmem %s40_s24, 256  ;;  %p168_p12 = scmp.lt.s32.totalorder %s40_s24, %s40_s24 }
  0x1b   :  { %p164_p11 = scmp.ne.s32.totalorder %s40_s24, %s163_s4  ;;  %p169_p13 = scmp.lt.s32.totalorder %s163_s4, %s163_s4 }
  0x1d   :  { %p170_p0 = por %p169_p13, %p168_p12 }
  0x1f   :  { %p171_p1 = pnand %p170_p0, %p164_p11 }
  0x21   :  { %174 = shalt.err (!%p171_p1)
}
  0x22   :  { %45 = dma.hbm_to_vmem [thread:$0]  %s260_s1, 256, %s40_s24, [#allocation6], %s204_s19, %s204_s19, %s205_s20  }
  0x23   :  { %197 = dma.done.wait [#allocation3], 256  }
  0x24   :  { %198 = vsyncadd [#allocation3], 4294967040 }
  0x25   :  { %199 = dma.done.wait [#allocation6], 256  }
  0x26   :  { %200 = vsyncadd [#allocation6], 4294967040  ;;  %v65_v0 = vld [vmem:[#allocation2] sm:$0xff]  ;;  %v66_v1 = vld [vmem:[#allocation2 + $0x8] sm:$0xff]  ;;  %s207_s1 = smov [#allocation7]  }
  0x27   :  { %v67_v2 = vld [vmem:[#allocation5] sm:$0xff]  ;;  %v68_v3 = vld [vmem:[#allocation5 + $0x8] sm:$0xff]  ;;  %s101_s6 = sshll.u32 %s207_s1, 4  ;;  %s102_s6 = int_to_ptr.vmem [resolvable:$true] %s101_s6 }
  0x28   :  { %v69_v4 = vsub.f32 %v65_v0, %v67_v2  ;;  %v70_v5 = vsub.f32 %v66_v1, %v68_v3  ;;  %s175_s7 = scalar_lea.vmem %s102_s6, 128  ;;  %p180_p3 = scmp.lt.s32.totalorder %s102_s6, %s102_s6 }
  0x29   :  { %p176_p2 = scmp.ne.s32.totalorder %s102_s6, %s175_s7  ;;  %p181_p4 = scmp.lt.s32.totalorder %s175_s7, %s175_s7 }
  0x2a   :  { %v71_v6 = vadd.f32 1e-12, %v69_v4  ;;  %v72_v7 = vadd.f32 1e-12, %v70_v5 }
  0x2b   :  { %p182_p5 = por %p181_p4, %p180_p3 }
  0x2c   :  { %v73_v8 = vand.u32 2147483647, %v71_v6  ;;  %v74_v9 = vand.u32 2147483647, %v72_v7 }
  0x2d   :  { %p183_p6 = pnand %p182_p5, %p176_p2 }
  0x2e   :  { %v75_v10 = vmul.f32 -2.0, %v73_v8  ;;  %v76_v11 = vmul.f32 -2.0, %v74_v9 }
  0x30   :  { %v77_v12 = vmul.f32 1.442695, %v75_v10  ;;  %v79_v13 = vmul.f32 1.442695, %v76_v11 }
  0x32   :  { %123 = vpow2.f32 %v77_v12 }
  0x33   :  { %125 = vpow2.f32 %v79_v13 }
  0x3c   :  { %v124_v14 = vpop.eup %123 }
  0x3d   :  { %v126_v15 = vpop.eup %125  ;;  %v81_v16 = vadd.f32 1.0, %v124_v14 }
  0x3e   :  { %v82_v17 = vadd.f32 1.0, %v126_v15 }
  0x3f   :  { %127 = vlog2.f32 %v81_v16 }
  0x40   :  { %129 = vlog2.f32 %v82_v17 }
  0x49   :  { %v128_v18 = vpop.eup %127 }
  0x4a   :  { %v130_v19 = vpop.eup %129  ;;  %v84_v20 = vmul.f32 0.6931472, %v128_v18 }
  0x4b   :  { %v86_v21 = vmul.f32 0.6931472, %v130_v19 }
  0x4c   :  { %v87_v22 = vadd.f32 %v84_v20, %v73_v8 }
  0x4d   :  { %v88_v23 = vadd.f32 %v86_v21, %v74_v9 }
  0x4e   :  { %v115_v24 = vadd.f32 -0.6931472, %v87_v22 }
  0x4f   :  { %v116_v25 = vadd.f32 -0.6931472, %v88_v23 }
  0x51   :  { %v92_v26 = vadd.f32 %v116_v25, %v115_v24 }
  0x53   :  { %94 = vst [vmem:[#allocation7] sm:$0xff] %v92_v26 }
  0x54   :  { %186 = shalt.err (!%p183_p6)
}
  0x55   :  { %s187_s10 = scalar_lea.hbm %s261_s2, 128 }
  0x56   :  { %p188_p7 = scmp.ne.s32.totalorder %s261_s2, %s187_s10  ;;  %p191_p8 = scmp.lt.u32.totalorder %s187_s10, %s261_s2 }
  0x58   :  { %p193_p9 = pnand %p191_p8, %p188_p7 }
  0x5a   :  { %196 = shalt.err (!%p193_p9)
}
  0x5b   :  { %104 = dma.vmem_to_hbm [thread:$0]  %s102_s6, 128, %s261_s2, [#allocation4]  }
  0x5c   :  { %201 = dma.done.wait [#allocation4], 128  }
  0x5d   :  { %202 = vsyncadd [#allocation4], 4294967168 }
  0x5e   :  { %108 = vsyncpa [#allocation3], 1 }
  0x5f   :  { %109 = vsyncpa [#allocation6], 1 }
  0x60   :  { %110 = vsyncpa [#allocation4], 1 }

</bundles_post_ra>
